<compile_context>
chip_gen: v7x
topology: tpu7x:2x2x1
jax: 0.10.0
libtpu: 0.0.40
codegen_flags: <defaults>
</compile_context>

<pallas_src>
import functools

import jax
import jax.numpy as jnp
from jax.experimental import pallas as pl
from jax.experimental.pallas import tpu as pltpu


def _label_smoothing_kernel(pred_ref, tgt_ref, out_ref, *,
                            smooth_val, confidence, total_n, tile_n):
    i = pl.program_id(0)

    pred = pred_ref[...].astype(jnp.float32)                 # (TILE_N, C)
    tn, c = pred.shape

    # Numerically stable log-softmax pieces (per row).
    m = jnp.max(pred, axis=-1, keepdims=True)                # (TILE_N, 1)
    shifted = pred - m
    lse = jnp.log(jnp.sum(jnp.exp(shifted), axis=-1, keepdims=True))  # (TILE_N, 1)

    # sum_c logp = sum_c shifted - C * lse   (no logp tensor materialized)
    row_logp_sum = jnp.sum(shifted, axis=-1, keepdims=True) - jnp.float32(c) * lse

    # logp at the target class via a single masked cross-lane sum
    # (replaces the full true_dist tensor + select + multiply).
    cls_ids = jax.lax.broadcasted_iota(jnp.int32, (tn, c), 1)
    tgt = tgt_ref[...]                                        # (TILE_N, 1) int32
    shifted_at_tgt = jnp.sum(jnp.where(cls_ids == tgt, shifted, 0.0),
                             axis=-1, keepdims=True)
    logp_at_tgt = shifted_at_tgt - lse                        # (TILE_N, 1)

    coef = jnp.float32(confidence - smooth_val)
    per_row = -(coef * logp_at_tgt + jnp.float32(smooth_val) * row_logp_sum)

    # Mask rows of the ragged last tile (N % TILE_N != 0).
    row_ids = i * tile_n + jax.lax.broadcasted_iota(jnp.int32, (tn, 1), 0)
    per_row = jnp.where(row_ids < total_n, per_row, 0.0)

    partial = jnp.sum(per_row)                                # scalar partial sum
    # Lane-dense output block (one full vreg) -> unmasked store; wrapper
    # reads [:, 0, 0] and finishes the mean.
    out_ref[...] = jnp.broadcast_to(partial, (1, 8, 128)).astype(jnp.float32)


def label_smoothing_pure(pred, target, *, classes=3, smoothing=0.0):
    """JAX/Pallas equivalent of LabelSmoothingPure(classes, smoothing)(pred, target)."""
    assert pred.ndim == 2 and pred.shape[1] == classes
    assert classes >= 2, "smoothing/(classes-1) is undefined for classes < 2"
    n, c = pred.shape
    confidence = 1.0 - smoothing
    smooth_val = smoothing / (classes - 1)
    tgt2d = target.astype(jnp.int32).reshape(n, 1)

    # Tile sizing: ~8 MiB per pred block (x2 double-buffering + f32 temps stays
    # well inside the 64 MiB raised scoped-VMEM limit on every generation).
    itemsize = jnp.dtype(pred.dtype).itemsize
    budget_bytes = 8 * 1024 * 1024
    tile_n = max(8, (budget_bytes // max(1, c * itemsize)) // 8 * 8)
    tile_n = min(tile_n, 1024)
    if n <= tile_n:
        tile_n = n                      # full-dim block is always layout-legal
    num_tiles = pl.cdiv(n, tile_n)

    kernel = functools.partial(
        _label_smoothing_kernel,
        smooth_val=float(smooth_val),
        confidence=float(confidence),
        total_n=n,
        tile_n=tile_n,
    )

    cost = pl.CostEstimate(
        flops=6 * n * c,
        transcendentals=n * c,                      # one exp per element
        bytes_accessed=n * c * itemsize + n * 4 + num_tiles * 8 * 128 * 4,
    )

    partials = pl.pallas_call(
        kernel,
        out_shape=jax.ShapeDtypeStruct((num_tiles, 8, 128), jnp.float32),
        grid_spec=pltpu.PrefetchScalarGridSpec(
            num_scalar_prefetch=0,
            grid=(num_tiles,),
            in_specs=[
                pl.BlockSpec((tile_n, c), lambda i: (i, 0)),
                pl.BlockSpec((tile_n, 1), lambda i: (i, 0)),
            ],
            out_specs=pl.BlockSpec((1, 8, 128), lambda i: (i, 0, 0)),
        ),
        compiler_params=pltpu.CompilerParams(
            dimension_semantics=("parallel",),       # megacore-shardable on v7x
            vmem_limit_bytes=64 * 1024 * 1024,
        ),
        cost_estimate=cost,
    )(pred, tgt2d)

    return jnp.sum(partials[:, 0, 0]) / jnp.float32(n)


def _reference(pred, target, *, classes=3, smoothing=0.0):
    confidence = 1.0 - smoothing
    logp = jax.nn.log_softmax(pred.astype(jnp.float32), axis=-1)
    true_dist = jnp.full_like(logp, smoothing / (classes - 1))
    true_dist = true_dist.at[jnp.arange(pred.shape[0]), target].set(confidence)
    return jnp.mean(jnp.sum(-true_dist * logp, axis=-1))


if __name__ == "__main__":
    classes = 3
    smoothing = 0.1

    key = jax.random.PRNGKey(0)

    # Small case matching the module defaults (batch=8, classes=3).
    kp, kt = jax.random.split(key)
    pred = jax.random.normal(kp, (8, classes), dtype=jnp.float32)
    target = jax.random.randint(kt, (8,), 0, classes, dtype=jnp.int32)

    loss = label_smoothing_pure(pred, target, classes=classes, smoothing=smoothing)
    loss = jax.block_until_ready(loss)
    ref = _reference(pred, target, classes=classes, smoothing=smoothing)
    assert jnp.allclose(loss, ref, atol=1e-5, rtol=1e-5), (loss, ref)

    # Multi-tile + ragged-last-tile case to exercise the grid/masking path.
    kp2, kt2 = jax.random.split(jax.random.PRNGKey(0), 2)
    n_big = 2050
    pred_big = jax.random.normal(kp2, (n_big, classes), dtype=jnp.float32)
    target_big = jax.random.randint(kt2, (n_big,), 0, classes, dtype=jnp.int32)

    loss_big = label_smoothing_pure(pred_big, target_big,
                                    classes=classes, smoothing=smoothing)
    loss_big = jax.block_until_ready(loss_big)
    ref_big = _reference(pred_big, target_big, classes=classes, smoothing=smoothing)
    assert jnp.allclose(loss_big, ref_big, atol=1e-4, rtol=1e-4), (loss_big, ref_big)

    print("KERNEL_OK")
</pallas_src>

<mosaic_0001>
module attributes {stable_mosaic.version = 11 : i64} {
  func.func @_label_smoothing_kernel(%arg0: i32, %arg1: memref<8x3xf32, #tpu.memory_space<vmem>>, %arg2: memref<8x1xi32, #tpu.memory_space<vmem>>, %arg3: memref<1x8x128xf32, #tpu.memory_space<vmem>>) attributes {dimension_semantics = [#tpu.dimension_semantics<parallel>], iteration_bounds = array<i64: 1>, scalar_prefetch = 0 : i64, scratch_operands = 0 : i64, tpu.core_type = #tpu.core_type<tc>, window_params = [{transform_indices = @transform_0, window_bounds = array<i64: 8, 3>}, {transform_indices = @transform_1, window_bounds = array<i64: 8, 1>}, {transform_indices = @transform_2, window_bounds = array<i64: 1, 8, 128>}]} {
    %c0 = arith.constant 0 : index
    %c0_0 = arith.constant 0 : index
    %0 = vector.load %arg1[%c0, %c0_0] : memref<8x3xf32, #tpu.memory_space<vmem>>, vector<8x3xf32>
    %cst = arith.constant dense<0xFF800000> : vector<8xf32>
    %1 = vector.multi_reduction <maximumf>, %0, %cst [1] : vector<8x3xf32> to vector<8xf32>
    %2 = vector.shape_cast %1 : vector<8xf32> to vector<8x1xf32>
    %3 = vector.broadcast %2 : vector<8x1xf32> to vector<8x3xf32>
    %4 = arith.subf %0, %3 : vector<8x3xf32>
    %5 = math.exp %4 : vector<8x3xf32>
    %cst_1 = arith.constant dense<0.000000e+00> : vector<8xf32>
    %6 = vector.multi_reduction <add>, %5, %cst_1 [1] : vector<8x3xf32> to vector<8xf32>
    %7 = vector.shape_cast %6 : vector<8xf32> to vector<8x1xf32>
    %8 = math.log %7 : vector<8x1xf32>
    %cst_2 = arith.constant dense<0.000000e+00> : vector<8xf32>
    %9 = vector.multi_reduction <add>, %4, %cst_2 [1] : vector<8x3xf32> to vector<8xf32>
    %10 = vector.shape_cast %9 : vector<8xf32> to vector<8x1xf32>
    %cst_3 = arith.constant 3.000000e+00 : f32
    %11 = vector.broadcast %cst_3 : f32 to vector<8x1xf32>
    %12 = arith.mulf %11, %8 : vector<8x1xf32>
    %13 = arith.subf %10, %12 : vector<8x1xf32>
    %14 = tpu.iota {dimensions = array<i32: 1>} : vector<8x3xi32>
    %c0_4 = arith.constant 0 : index
    %c0_5 = arith.constant 0 : index
    %15 = vector.load %arg2[%c0_4, %c0_5] : memref<8x1xi32, #tpu.memory_space<vmem>>, vector<8x1xi32>
    %16 = vector.broadcast %15 : vector<8x1xi32> to vector<8x3xi32>
    %17 = arith.cmpi eq, %14, %16 : vector<8x3xi32>
    %cst_6 = arith.constant 0.000000e+00 : f32
    %18 = vector.broadcast %cst_6 : f32 to vector<8x3xf32>
    %19 = arith.select %17, %4, %18 : vector<8x3xi1>, vector<8x3xf32>
    %cst_7 = arith.constant dense<0.000000e+00> : vector<8xf32>
    %20 = vector.multi_reduction <add>, %19, %cst_7 [1] : vector<8x3xf32> to vector<8xf32>
    %21 = vector.shape_cast %20 : vector<8xf32> to vector<8x1xf32>
    %22 = arith.subf %21, %8 : vector<8x1xf32>
    %cst_8 = arith.constant 8.500000e-01 : f32
    %23 = vector.broadcast %cst_8 : f32 to vector<8x1xf32>
    %24 = arith.mulf %23, %22 : vector<8x1xf32>
    %cst_9 = arith.constant 5.000000e-02 : f32
    %25 = vector.broadcast %cst_9 : f32 to vector<8x1xf32>
    %26 = arith.mulf %25, %13 : vector<8x1xf32>
    %27 = arith.addf %24, %26 : vector<8x1xf32>
    %cst_10 = arith.constant 0.000000e+00 : f32
    %28 = vector.broadcast %cst_10 : f32 to vector<8x1xf32>
    %29 = arith.subf %28, %27 : vector<8x1xf32>
    %c8_i32 = arith.constant 8 : i32
    %30 = arith.muli %arg0, %c8_i32 : i32
    %31 = tpu.iota {dimensions = array<i32: 0>} : vector<8x1xi32>
    %32 = vector.broadcast %30 : i32 to vector<8x1xi32>
    %33 = arith.addi %32, %31 : vector<8x1xi32>
    %c8_i32_11 = arith.constant 8 : i32
    %34 = vector.broadcast %c8_i32_11 : i32 to vector<8x1xi32>
    %35 = arith.cmpi slt, %33, %34 : vector<8x1xi32>
    %cst_12 = arith.constant 0.000000e+00 : f32
    %36 = vector.broadcast %cst_12 : f32 to vector<8x1xf32>
    %37 = arith.select %35, %29, %36 : vector<8x1xi1>, vector<8x1xf32>
    %38 = vector.shape_cast %37 : vector<8x1xf32> to vector<1x8x1xf32>
    %cst_13 = arith.constant dense<0.000000e+00> : vector<1xf32>
    %39 = vector.multi_reduction <add>, %38, %cst_13 [1, 2] : vector<1x8x1xf32> to vector<1xf32>
    %40 = vector.shape_cast %39 : vector<1xf32> to vector<1x1x1xf32>
    %41 = vector.extract %40[0, 0, 0] : f32 from vector<1x1x1xf32>
    %42 = vector.broadcast %41 : f32 to vector<1x8x128xf32>
    %c0_14 = arith.constant 0 : index
    %c0_15 = arith.constant 0 : index
    %c0_16 = arith.constant 0 : index
    %43 = vector.load %arg3[%c0_14, %c0_15, %c0_16] : memref<1x8x128xf32, #tpu.memory_space<vmem>>, vector<1x8x128xf32>
    tpu.vector_store %arg3[%c0_14, %c0_15, %c0_16], %42 {strides = array<i32>} : memref<1x8x128xf32, #tpu.memory_space<vmem>>, vector<1x8x128xf32>,
    return
  }
  func.func @transform_0(%arg0: i32) -> (i32, i32) {
    %c0_i32 = arith.constant 0 : i32
    %c0_i32_0 = arith.constant 0 : i32
    return %arg0, %c0_i32 : i32, i32
  }
  func.func @transform_1(%arg0: i32) -> (i32, i32) {
    %c0_i32 = arith.constant 0 : i32
    %c0_i32_0 = arith.constant 0 : i32
    return %arg0, %c0_i32 : i32, i32
  }
  func.func @transform_2(%arg0: i32) -> (i32, i32, i32) {
    %c0_i32 = arith.constant 0 : i32
    %c0_i32_0 = arith.constant 0 : i32
    %c0_i32_1 = arith.constant 0 : i32
    return %arg0, %c0_i32, %c0_i32_0 : i32, i32, i32
  }
}

</mosaic_0001>

<bundles_post_ra>
// kernel: tpu_custom_call.1
= control target key start
LH: loop header
LB: loop body
LE: loop exit
PB: predicated region body
PF: predicated region fallthrough
CT: control target
= control target key end

     0   :  { %7 = vsyncpa [#allocation3], 0  ;;  %s248_s0 = inlined_call_operand.hbm [shape: f32[8,3], index: 0, kind: input, shape index: {}]   ;;  %s249_s1 = inlined_call_operand.hbm [shape: s32[8,1], index: 1, kind: input, shape index: {}]   ;;  %s250_s2 = inlined_call_operand.hbm [shape: f32[1,8,128], index: 2, kind: output, shape index: {}]  }
   0x1   :  { %8 = vsyncpa [#allocation6], 0 }
   0x2   :  { %9 = vsyncpa [#allocation4], 0  ;;  %s189_s9 = smov [#allocation2]   ;;  %s190_s11 = smov [#allocation5]  }
   0x3   :  { %s16_s10 = sshll.u32 %s189_s9, 4  ;;  %s26_s12 = sshll.u32 %s190_s11, 4  ;;  %s17_s10 = int_to_ptr.vmem [resolvable:$true] %s16_s10  ;;  %s27_s12 = int_to_ptr.vmem [resolvable:$true] %s26_s12 }
   0x4   :  { %s117_s15 = scalar_lea.hbm %s248_s0, 128 }
   0x5   :  { %p118_p0 = scmp.ne.s32.totalorder %s248_s0, %s117_s15  ;;  %p121_p1 = scmp.lt.u32.totalorder %s117_s15, %s248_s0 }
   0x7   :  { %p123_p2 = pnand %p121_p1, %p118_p0 }
   0x9   :  { %126 = shalt.err (!%p123_p2)
}
   0xa   :  { %s127_s20 = scalar_lea.vmem %s17_s10, 128  ;;  %p132_p4 = scmp.lt.s32.totalorder %s17_s10, %s17_s10 }
   0xb   :  { %p128_p3 = scmp.ne.s32.totalorder %s17_s10, %s127_s20  ;;  %p133_p5 = scmp.lt.s32.totalorder %s127_s20, %s127_s20 }
   0xd   :  { %p134_p6 = por %p133_p5, %p132_p4 }
   0xf   :  { %p135_p7 = pnand %p134_p6, %p128_p3 }
  0x11   :  { %138 = shalt.err (!%p135_p7)
}
  0x12   :  { %19 = dma.hbm_to_vmem [thread:$0]  %s248_s0, 128, %s17_s10, [#allocation3]  }
  0x13   :  { %s139_s25 = scalar_lea.hbm %s249_s1, 128 }
  0x14   :  { %p140_p8 = scmp.ne.s32.totalorder %s249_s1, %s139_s25  ;;  %p143_p9 = scmp.lt.u32.totalorder %s139_s25, %s249_s1 }
  0x16   :  { %p145_p10 = pnand %p143_p9, %p140_p8 }
  0x18   :  { %148 = shalt.err (!%p145_p10)
}
  0x19   :  { %s149_s30 = scalar_lea.vmem %s27_s12, 128  ;;  %p154_p12 = scmp.lt.s32.totalorder %s27_s12, %s27_s12 }
  0x1a   :  { %p150_p11 = scmp.ne.s32.totalorder %s27_s12, %s149_s30  ;;  %p155_p13 = scmp.lt.s32.totalorder %s149_s30, %s149_s30 }
  0x1c   :  { %p156_p0 = por %p155_p13, %p154_p12 }
  0x1e   :  { %p157_p1 = pnand %p156_p0, %p150_p11 }
  0x20   :  { %160 = shalt.err (!%p157_p1)
}
  0x21   :  { %29 = dma.hbm_to_vmem [thread:$0]  %s249_s1, 128, %s27_s12, [#allocation6]  }
  0x22   :  { %183 = dma.done.wait [#allocation3], 128  }
  0x23   :  { %184 = vsyncadd [#allocation3], 4294967168 }
  0x24   :  { %185 = dma.done.wait [#allocation6], 128  }
  0x25   :  { %186 = vsyncadd [#allocation6], 4294967168  ;;  %v191_v0 = vmov 0   ;;  %vm37_vm0 = vcmask 23552   ;;  %v36_v1 = vld [vmem:[#allocation2] sm:$0xff]  ;;  %v56_v3 = vld [vmem:[#allocation5] sm:$0xff]  ;;  %v54_v7 = vlaneseq }
  0x26   :  { %112 = vset.pattern.permute.xlu0 %v191_v0  ;;  %v38_v2 = vsel %vm37_vm0, %v36_v1, -inf  ;;  %vm77_vm2 = vcmask 7168   ;;  %s192_s1 = smov [#allocation7]  }
  0x27   :  { %39 = vmax.xlane.f32.xlu0 %v38_v2  ;;  %v55_v8 = vand.u32 127, %v54_v7  ;;  %s96_s4 = sshll.u32 %s192_s1, 4  ;;  %s97_s4 = int_to_ptr.vmem [resolvable:$true] %s96_s4 }
  0x28   :  { %s161_s6 = scalar_lea.vmem %s97_s4, 128  ;;  %p166_p3 = scmp.lt.s32.totalorder %s97_s4, %s97_s4 }
  0x29   :  { %p162_p2 = scmp.ne.s32.totalorder %s97_s4, %s161_s6  ;;  %p167_p4 = scmp.lt.s32.totalorder %s161_s6, %s161_s6 }
  0x2b   :  { %p168_p5 = por %p167_p4, %p166_p3 }
  0x2d   :  { %p169_p6 = pnand %p168_p5, %p162_p2 }
  0x3d   :  { %58 = vperm.xlu0 %112, %v56_v3  }
  0xb4   :  { %v40_v4 = vpop.xlane.xlu0 %39 }
  0xb5   :  { %v41_v5 = vsub.f32 %v36_v1, %v40_v4 }
  0xb7   :  { %v42_v6 = vmul.f32 1.442695, %v41_v5  ;;  %v49_v12 = vsel %vm37_vm0, %v41_v5, 0.0 }
  0xb9   :  { %113 = vpow2.f32 %v42_v6 }
  0xbc   :  { %v59_v10 = vpop.permute.xlu0 %58 }
  0xbd   :  { %vm60_vm1 = vcmp.eq.s32.totalorder %v55_v8, %v59_v10 }
  0xbe   :  { %v61_v13 = vsel %vm60_vm1, %v41_v5, 0.0 }
  0xbf   :  { %v62_v14 = vsel %vm37_vm0, %v61_v13, 0.0 }
  0xc3   :  { %v114_v9 = vpop.eup %113 }
  0xc4   :  { %v44_v11 = vsel %vm37_vm0, %v114_v9, 0.0 }
  0xc5   :  { %45 = vadd.xlane.f32.xlu1 %v44_v11 }
  0xc9   :  { %50 = vadd.xlane.f32.xlu1 %v49_v12 }
  0xcd   :  { %63 = vadd.xlane.f32.xlu1 %v62_v14 }
 0x152   :  { %v46_v15 = vpop.xlane.xlu1 %45 }
 0x153   :  { %115 = vlog2.f32 %v46_v15 }
 0x156   :  { %v51_v16 = vpop.xlane.xlu1 %50 }
 0x15a   :  { %v64_v19 = vpop.xlane.xlu1 %63 }
 0x15d   :  { %v116_v17 = vpop.eup %115 }
 0x15e   :  { %v48_v18 = vmul.f32 0.6931472, %v116_v17 }
 0x160   :  { %v52_v20 = vmul.f32 3.0, %v48_v18  ;;  %v65_v21 = vsub.f32 %v64_v19, %v48_v18 }
 0x162   :  { %v53_v22 = vsub.f32 %v51_v16, %v52_v20  ;;  %v66_v24 = vmul.f32 0.85, %v65_v21 }
 0x164   :  { %v67_v23 = vmul.f32 0.05, %v53_v22 }
 0x166   :  { %v68_v25 = vadd.f32 %v67_v23, %v66_v24 }
 0x168   :  { %v69_v26 = vsub.f32 0.0, %v68_v25 }
 0x16a   :  { %v78_v27 = vsel %vm77_vm2, %v69_v26, 0.0 }
 0x16b   :  { %79 = vadd.xlane.f32.xlu1 %v78_v27 }
 0x1f8   :  { %v80_v28 = vpop.xlane.xlu1 %79 }
 0x1f9   :  { %v81_v29 = vrot.slane %v80_v28, 4 }
 0x1fb   :  { %v82_v30 = vadd.f32 %v81_v29, %v80_v28 }
 0x1fd   :  { %v83_v31 = vrot.slane %v82_v30, 2 }
 0x1ff   :  { %v84_v32 = vadd.f32 %v83_v31, %v82_v30 }
 0x201   :  { %v85_v33 = vrot.slane %v84_v32, 1 }
 0x203   :  { %v86_v34 = vadd.f32 %v85_v33, %v84_v32 }
 0x205   :  { %106 = vpush %v86_v34 }
 0x236   :  { %s107_s5 = spop %106 }
 0x237   :  { %v88_v35 = vstv %s107_s5 }
 0x238   :  { %89 = vst [vmem:[#allocation7] sm:$0xff] %v88_v35 }
 0x239   :  { %172 = shalt.err (!%p169_p6)
}
 0x23a   :  { %s173_s9 = scalar_lea.hbm %s250_s2, 128 }
 0x23b   :  { %p174_p7 = scmp.ne.s32.totalorder %s250_s2, %s173_s9  ;;  %p177_p8 = scmp.lt.u32.totalorder %s173_s9, %s250_s2 }
 0x23d   :  { %p179_p9 = pnand %p177_p8, %p174_p7 }
 0x23f   :  { %182 = shalt.err (!%p179_p9)
}
 0x240   :  { %99 = dma.vmem_to_hbm [thread:$0]  %s97_s4, 128, %s250_s2, [#allocation4]  }
 0x241   :  { %187 = dma.done.wait [#allocation4], 128  }
 0x242   :  { %188 = vsyncadd [#allocation4], 4294967168 }
 0x243   :  { %103 = vsyncpa [#allocation3], 1 }
 0x244   :  { %104 = vsyncpa [#allocation6], 1 }
 0x245   :  { %105 = vsyncpa [#allocation4], 1 }

</bundles_post_ra>
